<compile_context>
chip_gen: v6e
topology: v6e:2x2x1
jax: 0.10.0
libtpu: 0.0.40
codegen_flags: <defaults>
</compile_context>

<pallas_src>
import functools

import jax
import jax.numpy as jnp
from jax.experimental import pallas as pl
from jax.experimental.pallas import tpu as pltpu

H1, H2, H3 = 256, 256, 64  # hidden dims from the PyTorch DQN module


def dqn_mlp_kernel(x_ref, w1_ref, b1_ref, w2_ref, b2_ref,
                   w3_ref, b3_ref, w4_ref, b4_ref, o_ref):
    # bf16 operands into the MXU, f32 accumulation; bias add + ReLU in f32.
    x = x_ref[...].astype(jnp.bfloat16)

    h = jnp.dot(x, w1_ref[...], preferred_element_type=jnp.float32) + b1_ref[...]
    h = jnp.maximum(h, 0.0).astype(jnp.bfloat16)

    h = jnp.dot(h, w2_ref[...], preferred_element_type=jnp.float32) + b2_ref[...]
    h = jnp.maximum(h, 0.0).astype(jnp.bfloat16)

    h = jnp.dot(h, w3_ref[...], preferred_element_type=jnp.float32) + b3_ref[...]
    h = jnp.maximum(h, 0.0).astype(jnp.bfloat16)

    y = jnp.dot(h, w4_ref[...], preferred_element_type=jnp.float32) + b4_ref[...]
    o_ref[...] = y.astype(o_ref.dtype)  # lane-dense (TILE_B, 128*) store


@functools.partial(jax.jit, static_argnames=("tile_b",))
def dqn_forward(x, params, *, tile_b=256):
    """x: (B, s_dim) float32.  params: dict of (in,out) f32 weights and (1,out) f32 biases."""
    B, s_dim = x.shape
    a_dim = params["w4"].shape[1]

    # --- pad output lane dim up to a multiple of 128 for unmasked stores -------------
    out_pad = pl.cdiv(a_dim, 128) * 128
    w4 = params["w4"]
    b4 = params["b4"]
    if out_pad != a_dim:
        w4 = jnp.pad(w4, ((0, 0), (0, out_pad - a_dim)))
        b4 = jnp.pad(b4, ((0, 0), (0, out_pad - a_dim)))

    # --- batch tiling: small batches -> single grid point; large -> TILE_B tiles ------
    if B <= tile_b:
        TILE_B = max(8, pl.cdiv(B, 8) * 8)
    else:
        TILE_B = tile_b
    B_pad = pl.cdiv(B, TILE_B) * TILE_B
    x_p = x if B_pad == B else jnp.pad(x, ((0, B_pad - B), (0, 0)))

    # --- weights to bf16 (halves resident VMEM + feeds MXU natively); biases stay f32 --
    w1 = params["w1"].astype(jnp.bfloat16)
    w2 = params["w2"].astype(jnp.bfloat16)
    w3 = params["w3"].astype(jnp.bfloat16)
    w4 = w4.astype(jnp.bfloat16)
    b1, b2, b3 = params["b1"], params["b2"], params["b3"]

    grid = (B_pad // TILE_B,)

    def resident(arr):
        # full-array block, same block index every grid step -> stays in VMEM
        return pl.BlockSpec(arr.shape, lambda i: (0, 0))

    in_specs = [
        pl.BlockSpec((TILE_B, s_dim), lambda i: (i, 0)),   # x: tiled along batch
        resident(w1), resident(b1),
        resident(w2), resident(b2),
        resident(w3), resident(b3),
        resident(w4), resident(b4),
    ]
    out_specs = pl.BlockSpec((TILE_B, out_pad), lambda i: (i, 0))

    flops = 2 * B_pad * (s_dim * H1 + H1 * H2 + H2 * H3 + H3 * out_pad)
    bytes_accessed = (
        B_pad * s_dim * 4 + B_pad * out_pad * 4                     # activations in/out (f32)
        + (w1.size + w2.size + w3.size + w4.size) * 2               # bf16 weights
        + (b1.size + b2.size + b3.size + b4.size) * 4               # f32 biases
    )

    out = pl.pallas_call(
        dqn_mlp_kernel,
        out_shape=jax.ShapeDtypeStruct((B_pad, out_pad), jnp.float32),
        grid=grid,
        in_specs=in_specs,
        out_specs=out_specs,
        compiler_params=pltpu.CompilerParams(
            dimension_semantics=("parallel",),   # v7x: shard batch tiles across both TCs
        ),
        cost_estimate=pl.CostEstimate(
            flops=flops, transcendentals=0, bytes_accessed=bytes_accessed),
    )(x_p, w1, b1, w2, b2, w3, b3, w4, b4)

    return out[:B, :a_dim]


def init_dqn_params(key, s_dim, a_dim, h1=H1, h2=H2, h3=H3):
    """Deterministic init mimicking PyTorch nn.Linear default (uniform ±1/sqrt(fan_in)).
    Weights stored as (in, out); biases as (1, out)."""
    dims = [(s_dim, h1), (h1, h2), (h2, h3), (h3, a_dim)]
    params = {}
    for i, (fi, fo) in enumerate(dims, start=1):
        key, kw, kb = jax.random.split(key, 3)
        bound = 1.0 / jnp.sqrt(jnp.float32(fi))
        params[f"w{i}"] = jax.random.uniform(kw, (fi, fo), jnp.float32, -bound, bound)
        params[f"b{i}"] = jax.random.uniform(kb, (1, fo), jnp.float32, -bound, bound)
    return params


def dqn_forward_ref(x, params):
    y = jnp.maximum(x @ params["w1"] + params["b1"], 0.0)
    y = jnp.maximum(y @ params["w2"] + params["b2"], 0.0)
    y = jnp.maximum(y @ params["w3"] + params["b3"], 0.0)
    return y @ params["w4"] + params["b4"]


if __name__ == "__main__":
    key = jax.random.PRNGKey(0)

    s_dim, a_dim = 8, 4   # small shapes consistent with DQN(s_dim, a_dim, gamma)
    params = init_dqn_params(key, s_dim, a_dim)

    # bf16 matmul operands with f32 accumulation -> compare loosely against f32 reference
    TOL = 5e-2

    # 1) tiny batch (single grid point, as used by DQN.policy)
    key, kx = jax.random.split(key)
    x_small = jax.random.normal(kx, (8, s_dim), dtype=jnp.float32)
    q_small = dqn_forward(x_small, params)
    jax.block_until_ready(q_small)
    assert q_small.shape == (8, a_dim)
    assert jnp.allclose(q_small, dqn_forward_ref(x_small, params), atol=TOL, rtol=TOL)

    # 2) replay-batch sized input (exercises batch tiling + padding path)
    key, kx = jax.random.split(key)
    x_big = jax.random.normal(kx, (384, s_dim), dtype=jnp.float32)
    q_big = dqn_forward(x_big, params)
    jax.block_until_ready(q_big)
    assert q_big.shape == (384, a_dim)
    assert jnp.allclose(q_big, dqn_forward_ref(x_big, params), atol=TOL, rtol=TOL)

    print("KERNEL_OK")
</pallas_src>

<mosaic_0001>
module attributes {stable_mosaic.version = 11 : i64} {
  func.func @dqn_mlp_kernel(%arg0: i32, %arg1: memref<8x8xf32, #tpu.memory_space<vmem>>, %arg2: memref<8x256xbf16, #tpu.memory_space<vmem>>, %arg3: memref<1x256xf32, #tpu.memory_space<vmem>>, %arg4: memref<256x256xbf16, #tpu.memory_space<vmem>>, %arg5: memref<1x256xf32, #tpu.memory_space<vmem>>, %arg6: memref<256x64xbf16, #tpu.memory_space<vmem>>, %arg7: memref<1x64xf32, #tpu.memory_space<vmem>>, %arg8: memref<64x128xbf16, #tpu.memory_space<vmem>>, %arg9: memref<1x128xf32, #tpu.memory_space<vmem>>, %arg10: memref<8x128xf32, #tpu.memory_space<vmem>>) attributes {dimension_semantics = [#tpu.dimension_semantics<parallel>], iteration_bounds = array<i64: 1>, scalar_prefetch = 0 : i64, scratch_operands = 0 : i64, tpu.core_type = #tpu.core_type<tc>, window_params = [{transform_indices = @transform_0, window_bounds = array<i64: 8, 8>}, {pipeline_mode = #tpu.pipeline_mode<synchronous>, transform_indices = @transform_1, window_bounds = array<i64: 8, 256>}, {pipeline_mode = #tpu.pipeline_mode<synchronous>, transform_indices = @transform_2, window_bounds = array<i64: 1, 256>}, {pipeline_mode = #tpu.pipeline_mode<synchronous>, transform_indices = @transform_3, window_bounds = array<i64: 256, 256>}, {pipeline_mode = #tpu.pipeline_mode<synchronous>, transform_indices = @transform_4, window_bounds = array<i64: 1, 256>}, {pipeline_mode = #tpu.pipeline_mode<synchronous>, transform_indices = @transform_5, window_bounds = array<i64: 256, 64>}, {pipeline_mode = #tpu.pipeline_mode<synchronous>, transform_indices = @transform_6, window_bounds = array<i64: 1, 64>}, {pipeline_mode = #tpu.pipeline_mode<synchronous>, transform_indices = @transform_7, window_bounds = array<i64: 64, 128>}, {pipeline_mode = #tpu.pipeline_mode<synchronous>, transform_indices = @transform_8, window_bounds = array<i64: 1, 128>}, {transform_indices = @transform_9, window_bounds = array<i64: 8, 128>}]} {
    %c0 = arith.constant 0 : index
    %c0_0 = arith.constant 0 : index
    %0 = vector.load %arg1[%c0, %c0_0] : memref<8x8xf32, #tpu.memory_space<vmem>>, vector<8x8xf32>
    %1 = arith.truncf %0 : vector<8x8xf32> to vector<8x8xbf16>
    %c0_1 = arith.constant 0 : index
    %c0_2 = arith.constant 0 : index
    %2 = vector.load %arg2[%c0_1, %c0_2] : memref<8x256xbf16, #tpu.memory_space<vmem>>, vector<8x256xbf16>
    %cst = arith.constant dense<0.000000e+00> : vector<8x256xf32>
    %3 = tpu.matmul %1, %2, %cst {dimension_numbers = #tpu.dot_dimension_numbers<[1], [0], [0], [1], [0, 0, 1, 1], [], []>} : vector<8x8xbf16>, vector<8x256xbf16>, vector<8x256xf32> -> vector<8x256xf32>
    %c0_3 = arith.constant 0 : index
    %c0_4 = arith.constant 0 : index
    %4 = vector.load %arg3[%c0_3, %c0_4] : memref<1x256xf32, #tpu.memory_space<vmem>>, vector<1x256xf32>
    %5 = vector.broadcast %4 : vector<1x256xf32> to vector<8x256xf32>
    %6 = arith.addf %3, %5 : vector<8x256xf32>
    %cst_5 = arith.constant 0.000000e+00 : f32
    %7 = vector.broadcast %cst_5 : f32 to vector<8x256xf32>
    %8 = arith.maximumf %6, %7 : vector<8x256xf32>
    %9 = arith.truncf %8 : vector<8x256xf32> to vector<8x256xbf16>
    %c0_6 = arith.constant 0 : index
    %c0_7 = arith.constant 0 : index
    %10 = vector.load %arg4[%c0_6, %c0_7] : memref<256x256xbf16, #tpu.memory_space<vmem>>, vector<256x256xbf16>
    %cst_8 = arith.constant dense<0.000000e+00> : vector<8x256xf32>
    %11 = tpu.matmul %9, %10, %cst_8 {dimension_numbers = #tpu.dot_dimension_numbers<[1], [0], [0], [1], [0, 0, 1, 1], [], []>} : vector<8x256xbf16>, vector<256x256xbf16>, vector<8x256xf32> -> vector<8x256xf32>
    %c0_9 = arith.constant 0 : index
    %c0_10 = arith.constant 0 : index
    %12 = vector.load %arg5[%c0_9, %c0_10] : memref<1x256xf32, #tpu.memory_space<vmem>>, vector<1x256xf32>
    %13 = vector.broadcast %12 : vector<1x256xf32> to vector<8x256xf32>
    %14 = arith.addf %11, %13 : vector<8x256xf32>
    %cst_11 = arith.constant 0.000000e+00 : f32
    %15 = vector.broadcast %cst_11 : f32 to vector<8x256xf32>
    %16 = arith.maximumf %14, %15 : vector<8x256xf32>
    %17 = arith.truncf %16 : vector<8x256xf32> to vector<8x256xbf16>
    %c0_12 = arith.constant 0 : index
    %c0_13 = arith.constant 0 : index
    %18 = vector.load %arg6[%c0_12, %c0_13] : memref<256x64xbf16, #tpu.memory_space<vmem>>, vector<256x64xbf16>
    %cst_14 = arith.constant dense<0.000000e+00> : vector<8x64xf32>
    %19 = tpu.matmul %17, %18, %cst_14 {dimension_numbers = #tpu.dot_dimension_numbers<[1], [0], [0], [1], [0, 0, 1, 1], [], []>} : vector<8x256xbf16>, vector<256x64xbf16>, vector<8x64xf32> -> vector<8x64xf32>
    %c0_15 = arith.constant 0 : index
    %c0_16 = arith.constant 0 : index
    %20 = vector.load %arg7[%c0_15, %c0_16] : memref<1x64xf32, #tpu.memory_space<vmem>>, vector<1x64xf32>
    %21 = vector.broadcast %20 : vector<1x64xf32> to vector<8x64xf32>
    %22 = arith.addf %19, %21 : vector<8x64xf32>
    %cst_17 = arith.constant 0.000000e+00 : f32
    %23 = vector.broadcast %cst_17 : f32 to vector<8x64xf32>
    %24 = arith.maximumf %22, %23 : vector<8x64xf32>
    %25 = arith.truncf %24 : vector<8x64xf32> to vector<8x64xbf16>
    %c0_18 = arith.constant 0 : index
    %c0_19 = arith.constant 0 : index
    %26 = vector.load %arg8[%c0_18, %c0_19] : memref<64x128xbf16, #tpu.memory_space<vmem>>, vector<64x128xbf16>
    %cst_20 = arith.constant dense<0.000000e+00> : vector<8x128xf32>
    %27 = tpu.matmul %25, %26, %cst_20 {dimension_numbers = #tpu.dot_dimension_numbers<[1], [0], [0], [1], [0, 0, 1, 1], [], []>} : vector<8x64xbf16>, vector<64x128xbf16>, vector<8x128xf32> -> vector<8x128xf32>
    %c0_21 = arith.constant 0 : index
    %c0_22 = arith.constant 0 : index
    %28 = vector.load %arg9[%c0_21, %c0_22] : memref<1x128xf32, #tpu.memory_space<vmem>>, vector<1x128xf32>
    %29 = vector.broadcast %28 : vector<1x128xf32> to vector<8x128xf32>
    %30 = arith.addf %27, %29 : vector<8x128xf32>
    %c0_23 = arith.constant 0 : index
    %c0_24 = arith.constant 0 : index
    %31 = vector.load %arg10[%c0_23, %c0_24] : memref<8x128xf32, #tpu.memory_space<vmem>>, vector<8x128xf32>
    tpu.vector_store %arg10[%c0_23, %c0_24], %30 {strides = array<i32>} : memref<8x128xf32, #tpu.memory_space<vmem>>, vector<8x128xf32>,
    return
  }
  func.func @transform_0(%arg0: i32) -> (i32, i32) {
    %c0_i32 = arith.constant 0 : i32
    %c0_i32_0 = arith.constant 0 : i32
    return %arg0, %c0_i32 : i32, i32
  }
  func.func @transform_1(%arg0: i32) -> (i32, i32) {
    %c0_i32 = arith.constant 0 : i32
    %c0_i32_0 = arith.constant 0 : i32
    %c0_i32_1 = arith.constant 0 : i32
    return %c0_i32, %c0_i32_0 : i32, i32
  }
  func.func @transform_2(%arg0: i32) -> (i32, i32) {
    %c0_i32 = arith.constant 0 : i32
    %c0_i32_0 = arith.constant 0 : i32
    %c0_i32_1 = arith.constant 0 : i32
    return %c0_i32, %c0_i32_0 : i32, i32
  }
  func.func @transform_3(%arg0: i32) -> (i32, i32) {
    %c0_i32 = arith.constant 0 : i32
    %c0_i32_0 = arith.constant 0 : i32
    %c0_i32_1 = arith.constant 0 : i32
    return %c0_i32, %c0_i32_0 : i32, i32
  }
  func.func @transform_4(%arg0: i32) -> (i32, i32) {
    %c0_i32 = arith.constant 0 : i32
    %c0_i32_0 = arith.constant 0 : i32
    %c0_i32_1 = arith.constant 0 : i32
    return %c0_i32, %c0_i32_0 : i32, i32
  }
  func.func @transform_5(%arg0: i32) -> (i32, i32) {
    %c0_i32 = arith.constant 0 : i32
    %c0_i32_0 = arith.constant 0 : i32
    %c0_i32_1 = arith.constant 0 : i32
    return %c0_i32, %c0_i32_0 : i32, i32
  }
  func.func @transform_6(%arg0: i32) -> (i32, i32) {
    %c0_i32 = arith.constant 0 : i32
    %c0_i32_0 = arith.constant 0 : i32
    %c0_i32_1 = arith.constant 0 : i32
    return %c0_i32, %c0_i32_0 : i32, i32
  }
  func.func @transform_7(%arg0: i32) -> (i32, i32) {
    %c0_i32 = arith.constant 0 : i32
    %c0_i32_0 = arith.constant 0 : i32
    %c0_i32_1 = arith.constant 0 : i32
    return %c0_i32, %c0_i32_0 : i32, i32
  }
  func.func @transform_8(%arg0: i32) -> (i32, i32) {
    %c0_i32 = arith.constant 0 : i32
    %c0_i32_0 = arith.constant 0 : i32
    %c0_i32_1 = arith.constant 0 : i32
    return %c0_i32, %c0_i32_0 : i32, i32
  }
  func.func @transform_9(%arg0: i32) -> (i32, i32) {
    %c0_i32 = arith.constant 0 : i32
    %c0_i32_0 = arith.constant 0 : i32
    return %arg0, %c0_i32 : i32, i32
  }
}

</mosaic_0001>

<bundles_post_ra>
// kernel: dqn_forward.1
= control target key start
LH: loop header
LB: loop body
LE: loop exit
PB: predicated region body
PF: predicated region fallthrough
CT: control target
= control target key end

     0   :  { %vm57_vm0 = vcmask 1043456   ;;  %v794_v1 = vmov 0   ;;  %vm53_vm1 = vcmask 64512   ;;  %v38_v51 = vlaneseq  ;;  %s1024_s1 = inlined_call_operand.vmem [shape: bf16[8,256], index: 1, kind: input, shape index: {}]   ;;  %s1025_s0 = inlined_call_operand.vmem [shape: f32[8,8], index: 0, kind: input, shape index: {}]   ;;  %s1026_s3 = inlined_call_operand.vmem [shape: bf16[256,256], index: 3, kind: input, shape index: {}]   ;;  %s1027_s5 = inlined_call_operand.vmem [shape: bf16[256,64], index: 5, kind: input, shape index: {}]   ;;  %s1028_s2 = inlined_call_operand.vmem [shape: f32[1,256], index: 2, kind: input, shape index: {}]   ;;  %s1029_s7 = inlined_call_operand.vmem [shape: bf16[64,128], index: 7, kind: input, shape index: {}]   ;;  %s1030_s4 = inlined_call_operand.vmem [shape: f32[1,256], index: 4, kind: input, shape index: {}]   ;;  %s1031_s6 = inlined_call_operand.vmem [shape: f32[1,64], index: 6, kind: input, shape index: {}]   ;;  %s1032_s8 = inlined_call_operand.vmem [shape: f32[1,128], index: 8, kind: input, shape index: {}]   ;;  %s1033_s9 = inlined_call_operand.vmem [shape: f32[8,128], index: 9, kind: output, shape index: {}]  }
   0x1   :  { %v35_v0 = vld [vmem:[%s1024_s1] sm:$0xff]  ;;  %96 = vmatprep.mubr.bf16.mxu0 %v794_v1  ;;  %v726_v5 = vld [vmem:[%s1026_s3 + $0x74] ss:$8 sps:$4 sm:$0xff]   ;;  %v728_v6 = vld [vmem:[%s1026_s3 + $0x70] ss:$8 sps:$4 sm:$0xff]   ;;  %vm796_vm2 = vmmov 0  }
   0x2   :  { %v33_v2 = vld [vmem:[%s1025_s0] sm:$0xff]  ;;  %v624_v3 = vcombine.high %v35_v0, %v35_v0  ;;  %v623_v4 = vcombine.low %v35_v0, %v35_v0  ;;  %313 = vmatprep.subr.bf16.mxu1 %v726_v5  ;;  %v732_v11 = vld [vmem:[%s1026_s3 + $0x54] ss:$8 sps:$4 sm:$0xff]   ;;  %v734_v12 = vld [vmem:[%s1026_s3 + $0x50] ss:$8 sps:$4 sm:$0xff]   ;;  %v39_v52 = vshrl.u32 %v38_v51, 7 }
   0x3   :  { %v729_v7 = vld [vmem:[%s1026_s3 + $0x64] ss:$8 sps:$4 sm:$0xff]   ;;  %v34_v9 = vpack.c.bf16 %v33_v2, %v33_v2  ;;  %314 = vmatpush1.bf16.msra.mxu1 %v728_v6  ;;  %v731_v10 = vld [vmem:[%s1026_s3 + $0x60] ss:$8 sps:$4 sm:$0xff]   ;;  %v738_v15 = vld [vmem:[%s1026_s3 + $0x34] ss:$8 sps:$4 sm:$0xff]  }
   0x4   :  { %625 = vmatprep.subr.msk.bf16.mxu0 %vm57_vm0, %v624_v3  ;;  %v59_v8 = vsel %vm57_vm0, %v623_v4, 0  ;;  %315 = vmatprep.subr.bf16.mxu1 %v729_v7  ;;  %v735_v13 = vld [vmem:[%s1026_s3 + $0x44] ss:$8 sps:$4 sm:$0xff]   ;;  %v737_v14 = vld [vmem:[%s1026_s3 + $0x40] ss:$8 sps:$4 sm:$0xff]   ;;  %v774_v39 = vld [vmem:[%s1027_s5 + $0x78] sm:$0xff]  }
   0x5   :  { %79 = vmatpush1.bf16.msra.mxu0 %v59_v8  ;;  %v740_v16 = vld [vmem:[%s1026_s3 + $0x30] ss:$8 sps:$4 sm:$0xff]   ;;  %v741_v17 = vld [vmem:[%s1026_s3 + $0x24] ss:$8 sps:$4 sm:$0xff]   ;;  %v743_v18 = vld [vmem:[%s1026_s3 + $0x20] ss:$8 sps:$4 sm:$0xff]  }
   0x6   :  { %v744_v19 = vld [vmem:[%s1026_s3 + $0x14] ss:$8 sps:$4 sm:$0xff]   ;;  %v746_v20 = vld [vmem:[%s1026_s3 + $0x10] ss:$8 sps:$4 sm:$0xff]   ;;  %v747_v21 = vld [vmem:[%s1026_s3 + $0x4] ss:$8 sps:$4 sm:$0xff]   ;;  %682 = vmatprep.subr.bf16.mxu0 %v774_v39 }
   0x7   :  { %316 = vmatpush1.bf16.msra.mxu1 %v731_v10  ;;  %v749_v22 = vld [vmem:[%s1026_s3] ss:$8 sps:$4 sm:$0xff]   ;;  %v750_v23 = vld [vmem:[%s1026_s3 + $0xf4] ss:$8 sps:$4 sm:$0xff]   ;;  %v752_v24 = vld [vmem:[%s1026_s3 + $0xf0] ss:$8 sps:$4 sm:$0xff]  }
   0x8   :  { %626 = vmatmul.mubr.msk.bf16.vlgmr.msra.gmra.mxu0 %vm53_vm1, %v34_v9  ;;  %317 = vmatprep.subr.bf16.mxu1 %v732_v11  ;;  %v753_v25 = vld [vmem:[%s1026_s3 + $0xe4] ss:$8 sps:$4 sm:$0xff]   ;;  %v755_v26 = vld [vmem:[%s1026_s3 + $0xe0] ss:$8 sps:$4 sm:$0xff]   ;;  %v756_v27 = vld [vmem:[%s1026_s3 + $0xd4] ss:$8 sps:$4 sm:$0xff]  }
   0x9   :  { %v758_v28 = vld [vmem:[%s1026_s3 + $0xd0] ss:$8 sps:$4 sm:$0xff]   ;;  %v759_v29 = vld [vmem:[%s1026_s3 + $0xc4] ss:$8 sps:$4 sm:$0xff]   ;;  %v761_v30 = vld [vmem:[%s1026_s3 + $0xc0] ss:$8 sps:$4 sm:$0xff]  }
   0xa   :  { %v762_v31 = vld [vmem:[%s1026_s3 + $0xb4] ss:$8 sps:$4 sm:$0xff]   ;;  %v764_v32 = vld [vmem:[%s1026_s3 + $0xb0] ss:$8 sps:$4 sm:$0xff]   ;;  %v765_v33 = vld [vmem:[%s1026_s3 + $0xa4] ss:$8 sps:$4 sm:$0xff]  }
   0xb   :  { %318 = vmatpush1.bf16.msra.mxu1 %v734_v12  ;;  %v767_v34 = vld [vmem:[%s1026_s3 + $0xa0] ss:$8 sps:$4 sm:$0xff]   ;;  %v768_v35 = vld [vmem:[%s1026_s3 + $0x94] ss:$8 sps:$4 sm:$0xff]   ;;  %v770_v36 = vld [vmem:[%s1026_s3 + $0x90] ss:$8 sps:$4 sm:$0xff]  }
   0xc   :  { %319 = vmatprep.subr.bf16.mxu1 %v735_v13  ;;  %v771_v37 = vld [vmem:[%s1026_s3 + $0x84] ss:$8 sps:$4 sm:$0xff]   ;;  %v773_v38 = vld [vmem:[%s1026_s3 + $0x80] ss:$8 sps:$4 sm:$0xff]   ;;  %v775_v40 = vld [vmem:[%s1027_s5 + $0x38] sm:$0xff]   ;;  %v40_v53 = vsub.s32 0, %v39_v52 }
   0xd   :  { %v776_v41 = vld [vmem:[%s1027_s5 + $0x70] sm:$0xff]   ;;  %683 = vmatpush3.bf16.msra.mxu0 %v775_v40  ;;  %v778_v43 = vld [vmem:[%s1027_s5 + $0x68] sm:$0xff]   ;;  %v780_v45 = vld [vmem:[%s1027_s5 + $0x60] sm:$0xff]   ;;  %v44_v55 = vsub.s32 1, %v39_v52  ;;  %v795_v8 = vmov 0.0   ;;  %vm574_vm3 = vcmask 523264  }
   0xe   :  { %v777_v42 = vld [vmem:[%s1027_s5 + $0x30] sm:$0xff]   ;;  %684 = vmatprep.subr.bf16.mxu0 %v776_v41  ;;  %v779_v44 = vld [vmem:[%s1027_s5 + $0x28] sm:$0xff]   ;;  %v781_v46 = vld [vmem:[%s1027_s5 + $0x20] sm:$0xff]  }
   0xf   :  { %320 = vmatpush1.bf16.msra.mxu1 %v737_v14  ;;  %v782_v47 = vld [vmem:[%s1027_s5 + $0x58] sm:$0xff]   ;;  %v784_v49 = vld [vmem:[%s1027_s5 + $0x50] sm:$0xff]   ;;  %v36_v54 = vld [vmem:[%s1028_s2] sm:$0x3] }
  0x10   :  { %321 = vmatprep.subr.bf16.mxu1 %v738_v15  ;;  %v783_v48 = vld [vmem:[%s1027_s5 + $0x18] sm:$0xff]   ;;  %v785_v50 = vld [vmem:[%s1027_s5 + $0x10] sm:$0xff]   ;;  %v41_v56 = vrot.slane %v36_v54, %v40_v53  ;;  %v45_v57 = vrot.slane %v36_v54, %v44_v55  ;;  %v786_v4 = vld [vmem:[%s1027_s5 + $0x48] sm:$0xff]  }
  0x11   :  { %685 = vmatpush3.bf16.msra.mxu0 %v777_v42  ;;  %v787_v5 = vld [vmem:[%s1027_s5 + $0x8] sm:$0xff]   ;;  %v788_v6 = vld [vmem:[%s1027_s5 + $0x40] sm:$0xff]  }
  0x12   :  { %686 = vmatprep.subr.bf16.mxu0 %v778_v43  ;;  %v789_v7 = vld [vmem:[%s1027_s5] sm:$0xff]  }
  0x13   :  { %322 = vmatpush1.bf16.msra.mxu1 %v740_v16  ;;  %v141_v9 = vld [vmem:[%s1030_s4] sm:$0x3] }
  0x14   :  { %323 = vmatprep.subr.bf16.mxu1 %v741_v17  ;;  %v146_v10 = vrot.slane %v141_v9, %v40_v53  ;;  %v150_v11 = vrot.slane %v141_v9, %v44_v55 }
  0x15   :  { %687 = vmatpush3.bf16.msra.mxu0 %v779_v44 }
  0x16   :  { %688 = vmatprep.subr.bf16.mxu0 %v780_v45 }
  0x17   :  { %324 = vmatpush1.bf16.msra.mxu1 %v743_v18 }
  0x18   :  { %325 = vmatprep.subr.bf16.mxu1 %v744_v19 }
  0x19   :  { %689 = vmatpush3.bf16.msra.mxu0 %v781_v46 }
  0x1a   :  { %690 = vmatprep.subr.bf16.mxu0 %v782_v47 }
  0x1b   :  { %326 = vmatpush1.bf16.msra.mxu1 %v746_v20 }
  0x1c   :  { %327 = vmatprep.subr.bf16.mxu1 %v747_v21  ;;  %v790_v21 = vld [vmem:[%s1029_s7 + $0x18] sm:$0xff]  }
  0x1d   :  { %691 = vmatpush3.bf16.msra.mxu0 %v783_v48 }
  0x1e   :  { %692 = vmatprep.subr.bf16.mxu0 %v784_v49 }
  0x1f   :  { %328 = vmatpush1.bf16.msra.mxu1 %v749_v22 }
  0x20   :  { %329 = vmatprep.subr.bf16.mxu1 %v750_v23  ;;  %v791_v23 = vld [vmem:[%s1029_s7 + $0x10] sm:$0xff]  }
  0x21   :  { %693 = vmatpush3.bf16.msra.mxu0 %v785_v50 }
  0x22   :  { %694 = vmatprep.subr.bf16.mxu0 %v786_v4 }
  0x23   :  { %330 = vmatpush2.bf16.msra.mxu1 %v752_v24  ;;  %v792_v24 = vld [vmem:[%s1029_s7 + $0x8] sm:$0xff]  }
  0x24   :  { %331 = vmatprep.subr.bf16.mxu1 %v753_v25  ;;  %v793_v25 = vld [vmem:[%s1029_s7] sm:$0xff]  }
  0x25   :  { %695 = vmatpush3.bf16.msra.mxu0 %v787_v5 }
  0x26   :  { %696 = vmatprep.subr.bf16.mxu0 %v788_v6 }
  0x27   :  { %332 = vmatpush2.bf16.msra.mxu1 %v755_v26 }
  0x28   :  { %333 = vmatprep.subr.bf16.mxu1 %v756_v27  ;;  %v659_v27 = vld [vmem:[%s1031_s6] ss:$0 sm:$0xff] }
  0x29   :  { %697 = vmatpush3.bf16.msra.mxu0 %v789_v7 }
  0x2a   :  { %709 = vmatprep.subr.bf16.mxu0 %v795_v8 }
  0x2b   :  { %334 = vmatpush2.bf16.msra.mxu1 %v758_v28 }
  0x2c   :  { %335 = vmatprep.subr.bf16.mxu1 %v759_v29 }
  0x2f   :  { %336 = vmatpush2.bf16.msra.mxu1 %v761_v30 }
  0x30   :  { %337 = vmatprep.subr.bf16.mxu1 %v762_v31 }
  0x33   :  { %338 = vmatpush2.bf16.msra.mxu1 %v764_v32 }
  0x34   :  { %339 = vmatprep.subr.bf16.mxu1 %v765_v33 }
  0x37   :  { %340 = vmatpush2.bf16.msra.mxu1 %v767_v34 }
  0x38   :  { %341 = vmatprep.subr.bf16.mxu1 %v768_v35  ;;  %v676_v35 = vld [vmem:[%s1032_s8] ss:$0 sm:$0xff] }
  0x3b   :  { %342 = vmatpush2.bf16.msra.mxu1 %v770_v36 }
  0x3c   :  { %343 = vmatprep.subr.bf16.mxu1 %v771_v37 }
  0x3f   :  { %344 = vmatpush2.bf16.msra.mxu1 %v773_v38 }
  0xc8   :  { %v98_v58 = vpop.f32.mrf.mxu0 }
  0xc9   :  { %v99_v59 = vadd.f32 %v98_v58, %v41_v56 }
  0xca   :  { %v100_v60 = vpop.f32.mrf.mxu0 }
  0xcb   :  { %v101_v61 = vadd.f32 %v100_v60, %v45_v57  ;;  %v105_v62 = vmax.f32 %v99_v59, 0.0 }
  0xcc   :  { %v102_v63 = vpop.f32.mrf.mxu0 }
  0xcd   :  { %v106_v0 = vmax.f32 %v101_v61, 0.0  ;;  %v107_v3 = vpack.c.bf16 %v105_v62, %v105_v62 }
  0xce   :  { %v103_v1 = vpop.f32.mrf.mxu0 }
  0xcf   :  { %v108_v2 = vpack.c.bf16 %v106_v0, %v106_v0 }
  0xd1   :  { %345 = vmatprep.mubr.bf16.mxu1 %v108_v2 }
  0xd2   :  { %346 = vmatmul.mubr.bf16.vlgmr.msra.gmra.mxu1 %v107_v3 }
 0x192   :  { %v347_v12 = vpop.f32.mrf.mxu1 }
 0x193   :  { %v348_v13 = vadd.f32 %v347_v12, %v146_v10 }
 0x194   :  { %v349_v14 = vpop.f32.mrf.mxu1 }
 0x195   :  { %v350_v15 = vadd.f32 %v349_v14, %v150_v11  ;;  %v354_v16 = vmax.f32 %v348_v13, 0.0 }
 0x196   :  { %v351_v17 = vpop.f32.mrf.mxu1 }
 0x197   :  { %v355_v18 = vmax.f32 %v350_v15, 0.0  ;;  %v356_v22 = vpack.c.bf16 %v354_v16, %v354_v16 }
 0x198   :  { %v352_v19 = vpop.f32.mrf.mxu1 }
 0x199   :  { %v357_v20 = vpack.c.bf16 %v355_v18, %v355_v18 }
 0x19b   :  { %525 = vmatprep.mubr.bf16.mxu0 %v357_v20 }
 0x19c   :  { %526 = vmatmul.mubr.bf16.vlgmr.msra.gmra.mxu0 %v356_v22 }
 0x19d   :  { %710 = vmatpush3.bf16.msra.mxu0 %v790_v21  ;;  %717 = vmatprep.mubr.msk.bf16.mxu0 %vm796_vm2, %v795_v8 }
 0x19e   :  { %711 = vmatprep.subr.bf16.mxu0 %v795_v8 }
 0x1a1   :  { %712 = vmatpush3.bf16.msra.mxu0 %v791_v23 }
 0x1a2   :  { %713 = vmatprep.subr.bf16.mxu0 %v795_v8 }
 0x1a5   :  { %714 = vmatpush3.bf16.msra.mxu0 %v792_v24 }
 0x1a6   :  { %715 = vmatprep.subr.bf16.mxu0 %v795_v8 }
 0x1a9   :  { %716 = vmatpush3.bf16.msra.mxu0 %v793_v25 }
 0x25c   :  { %v698_v26 = vpop.f32.mrf.mxu0 }
 0x25e   :  { %v699_v28 = vpop.f32.mrf.mxu0 }
 0x25f   :  { %v700_v29 = vadd.f32 %v699_v28, %v698_v26 }
 0x260   :  { %v701_v30 = vpop.f32.mrf.mxu0 }
 0x261   :  { %v528_v31 = vadd.f32 %v700_v29, %v659_v27 }
 0x262   :  { %v702_v32 = vpop.f32.mrf.mxu0 }
 0x263   :  { %v533_v33 = vmax.f32 %v528_v31, 0.0 }
 0x265   :  { %v534_v34 = vpack.c.bf16 %v533_v33, %v533_v33 }
 0x267   :  { %718 = vmatmul.mubr.msk.bf16.vlgmr.msra.gmra.mxu0 %vm574_vm3, %v534_v34 }
 0x327   :  { %v612_v36 = vpop.f32.mrf.mxu0 }
 0x328   :  { %v613_v37 = vadd.f32 %v676_v35, %v612_v36 }
 0x329   :  { %v719_v38 = vpop.f32.mrf.mxu0 }
 0x32a   :  { %618 = vst [vmem:[%s1033_s9] sm:$0xff] %v613_v37 }
 0x32b   :  { %v615_v39 = vpop.f32.mrf.mxu0 }
 0x32d   :  { %v720_v40 = vpop.f32.mrf.mxu0 }

</bundles_post_ra>
